<compile_context>
chip_gen: v7x
topology: tpu7x:2x2x1
jax: 0.10.0
libtpu: 0.0.40
codegen_flags: <defaults>
</compile_context>

<pallas_src>
import functools

import jax
import jax.numpy as jnp
from jax.experimental import pallas as pl
from jax.experimental.pallas import tpu as pltpu

EPS = 1e-5          # nn.BatchNorm2d default eps
NEG_SLOPE = 0.2     # nn.LeakyReLU(0.2)
VMEM_LIMIT = 32 * 1024 * 1024


# ---------------------------------------------------------------------------
# Kernels
# ---------------------------------------------------------------------------
def _conv_taps(x, w_ref, th, wd, cin, cp):
    """3x3 conv of one halo'd row strip as 9 shifted matmuls (f32 accum).

    x: (TH+2, W+2, Cin) activation strip (compute dtype, e.g. bf16)
    w_ref: (9, Cin, CP) weights ref (CP = Cout padded to 128 lanes)
    returns: (TH*W, CP) f32
    """
    acc = jnp.zeros((th * wd, cp), jnp.float32)
    for tap in range(9):
        ky, kx = tap // 3, tap % 3
        patch = x[ky:ky + th, kx:kx + wd, :].reshape(th * wd, cin)
        acc = acc + jnp.dot(patch, w_ref[tap],
                            preferred_element_type=jnp.float32)
    return acc


def _conv_stats_kernel(x_ref, w_ref, ps_ref, *, th, wd, cin, cp):
    """Pass 1: per-tile per-channel sum / sum-of-squares of the conv output."""
    acc = _conv_taps(x_ref[...], w_ref, th, wd, cin, cp)
    ps_ref[0:1, :] = jnp.sum(acc, axis=0, keepdims=True)
    ps_ref[1:2, :] = jnp.sum(acc * acc, axis=0, keepdims=True)


def _conv_apply_kernel(x_ref, w_ref, scale_ref, shift_ref, *rest,
                       th, wd, cin, cout, cp, use_act, add_residual):
    """Pass 2: conv recompute + fused BN apply [+ LeakyReLU] [+ residual]."""
    if add_residual:
        res_ref, o_ref = rest
    else:
        (o_ref,) = rest
    acc = _conv_taps(x_ref[...], w_ref, th, wd, cin, cp)
    y = acc * scale_ref[...] + shift_ref[...]        # BN in f32
    if use_act:
        y = jnp.where(y > 0, y, NEG_SLOPE * y)       # LeakyReLU(0.2)
    y = y[:, :cout]                                  # drop lane padding
    if add_residual:
        y = y + res_ref[...].astype(jnp.float32)
    o_ref[...] = y.astype(o_ref.dtype)


# ---------------------------------------------------------------------------
# Wrappers
# ---------------------------------------------------------------------------
def _round_up(v, m):
    return (v + m - 1) // m * m


def _choose_tile_rows(hh, wd, cin, cout, cp, in_itemsize,
                      budget_bytes=4 * 1024 * 1024):
    """Largest divisor of H whose per-step working set fits a small budget,
    so double-buffered tiles stay well inside v7x's 64 MiB VMEM."""
    best = 1
    for th in range(1, hh + 1):
        if hh % th:
            continue
        in_tile = (th + 2) * (wd + 2) * cin * in_itemsize
        io_tile = th * wd * cout * 4
        acc = th * wd * cp * 4
        if 2 * in_tile + 4 * io_tile + acc <= budget_bytes:
            best = th
    return best


def conv_block_pallas(x_nhwc, weight, gamma, beta, *, use_act,
                      residual=None, compute_dtype=jnp.bfloat16,
                      out_dtype=jnp.float32, tile_rows=None):
    """One ConvBlock: conv3x3(s1,p1) + BatchNorm2d(batch stats) [+ LeakyReLU]
    [+ residual].  NHWC in / NHWC out.

    The conv bias is intentionally omitted: a per-channel constant added
    before BatchNorm is exactly cancelled by the mean subtraction.
    """
    n, hh, wd, cin = x_nhwc.shape
    cout = weight.shape[0]
    assert weight.shape == (cout, cin, 3, 3), weight.shape
    cp = _round_up(cout, 128)                       # lane-dense accumulator

    in_itemsize = jnp.dtype(compute_dtype).itemsize
    th = tile_rows or _choose_tile_rows(hh, wd, cin, cout, cp, in_itemsize)
    assert hh % th == 0, (hh, th)
    nt = hh // th

    # Halo'd row strips (N, nT, TH+2, W+2, Cin) in the compute dtype.  Only
    # the 2-row halo is duplicated (vs. the 9x blow-up of a full im2col).
    xpad = jnp.pad(x_nhwc, ((0, 0), (1, 1), (1, 1), (0, 0)))
    strips = jnp.stack([xpad[:, t * th:t * th + th + 2] for t in range(nt)],
                       axis=1).astype(compute_dtype)

    # (Cout, Cin, 3, 3) -> (9, Cin, CP), zero-padded along the lane dim.
    wmat = jnp.transpose(weight, (2, 3, 1, 0)).reshape(9, cin, cout)
    wmat = jnp.pad(wmat, ((0, 0), (0, 0), (0, cp - cout))).astype(compute_dtype)

    strip_spec = pl.BlockSpec((None, None, th + 2, wd + 2, cin),
                              lambda i, j: (i, j, 0, 0, 0))
    wmat_spec = pl.BlockSpec((9, cin, cp), lambda i, j: (0, 0, 0))
    cparams = pltpu.CompilerParams(
        dimension_semantics=("parallel", "parallel"),
        vmem_limit_bytes=VMEM_LIMIT)

    # ---- pass 1: per-tile per-channel sum / sum-of-squares ----------------
    partials = pl.pallas_call(
        functools.partial(_conv_stats_kernel, th=th, wd=wd, cin=cin, cp=cp),
        out_shape=jax.ShapeDtypeStruct((n, nt, 2, cp), jnp.float32),
        grid=(n, nt),
        in_specs=[strip_spec, wmat_spec],
        out_specs=pl.BlockSpec((None, None, 2, cp),
                               lambda i, j: (i, j, 0, 0)),
        compiler_params=cparams,
    )(strips, wmat)

    # Global batch statistics (biased variance — BatchNorm2d training mode),
    # folded into a single per-channel scale/shift (all f32).
    cnt = jnp.float32(n * hh * wd)
    sums = jnp.sum(partials, axis=(0, 1))           # (2, CP)
    mean = sums[0] / cnt
    var = jnp.maximum(sums[1] / cnt - mean * mean, 0.0)
    gpad = jnp.pad(gamma.astype(jnp.float32), (0, cp - cout))
    bpad = jnp.pad(beta.astype(jnp.float32), (0, cp - cout))
    scale = (gpad * jax.lax.rsqrt(var + EPS)).reshape(1, cp)
    shift = (bpad - mean * scale[0]).reshape(1, cp)

    # ---- pass 2: conv recompute + BN apply + act + residual ---------------
    args = [strips, wmat, scale, shift]
    in_specs = [strip_spec, wmat_spec,
                pl.BlockSpec((1, cp), lambda i, j: (0, 0)),
                pl.BlockSpec((1, cp), lambda i, j: (0, 0))]
    add_residual = residual is not None
    if add_residual:
        assert residual.shape == (n, hh, wd, cout)
        args.append(residual.reshape(n, nt, th * wd, cout)
                    .astype(jnp.float32))
        in_specs.append(pl.BlockSpec((None, None, th * wd, cout),
                                     lambda i, j: (i, j, 0, 0)))

    out = pl.pallas_call(
        functools.partial(_conv_apply_kernel, th=th, wd=wd, cin=cin,
                          cout=cout, cp=cp, use_act=use_act,
                          add_residual=add_residual),
        out_shape=jax.ShapeDtypeStruct((n, nt, th * wd, cout), out_dtype),
        grid=(n, nt),
        in_specs=in_specs,
        out_specs=pl.BlockSpec((None, None, th * wd, cout),
                               lambda i, j: (i, j, 0, 0)),
        compiler_params=cparams,
        cost_estimate=pl.CostEstimate(
            flops=2 * n * hh * wd * 9 * cin * cp,
            transcendentals=0,
            bytes_accessed=int(strips.size) * in_itemsize
            + n * hh * wd * cout * jnp.dtype(out_dtype).itemsize),
    )(*args)
    return out.reshape(n, hh, wd, cout)


def resblock_forward(x_nchw, params, *, compute_dtype=jnp.bfloat16,
                     tile_rows=None):
    """ResBlock forward: x + block2(block1(x)).  NCHW in / NCHW out.
    params['b1']/['b2'] (conv biases) are accepted but unused — a bias added
    before BatchNorm is a mathematical no-op (cancelled by mean subtraction).
    """
    x = jnp.transpose(x_nchw, (0, 2, 3, 1)).astype(jnp.float32)   # NHWC
    h = conv_block_pallas(x, params["w1"], params["g1"], params["beta1"],
                          use_act=True, compute_dtype=compute_dtype,
                          out_dtype=compute_dtype, tile_rows=tile_rows)
    y = conv_block_pallas(h, params["w2"], params["g2"], params["beta2"],
                          use_act=False, residual=x,
                          compute_dtype=compute_dtype,
                          out_dtype=jnp.float32, tile_rows=tile_rows)
    return jnp.transpose(y, (0, 3, 1, 2))                          # NCHW


# ---------------------------------------------------------------------------
# Precision-matched pure-JAX reference (correctness check only)
# ---------------------------------------------------------------------------
def _conv_block_ref(x, w, b, g, beta, use_act, conv_dtype):
    y = jax.lax.conv_general_dilated(
        x.astype(conv_dtype), w.astype(conv_dtype),
        window_strides=(1, 1), padding=((1, 1), (1, 1)),
        dimension_numbers=("NCHW", "OIHW", "NCHW"),
        preferred_element_type=jnp.float32)
    y = y + b[None, :, None, None]
    mean = jnp.mean(y, axis=(0, 2, 3), keepdims=True)
    var = jnp.mean((y - mean) ** 2, axis=(0, 2, 3), keepdims=True)
    y = (y - mean) * jax.lax.rsqrt(var + EPS)
    y = y * g[None, :, None, None] + beta[None, :, None, None]
    return jnp.where(y > 0, y, NEG_SLOPE * y) if use_act else y


def resblock_ref(x, p, conv_dtype=jnp.float32):
    h = _conv_block_ref(x, p["w1"], p["b1"], p["g1"], p["beta1"], True,
                        conv_dtype)
    y = _conv_block_ref(h, p["w2"], p["b2"], p["g2"], p["beta2"], False,
                        conv_dtype)
    return x + y


# ---------------------------------------------------------------------------
if __name__ == "__main__":
    N, C, H, W = 2, 4, 16, 16          # ni == no == 4, ks == 3
    KS = 3

    key = jax.random.PRNGKey(0)
    keys = jax.random.split(key, 9)

    x = jax.random.normal(keys[0], (N, C, H, W), jnp.float32)
    params = {
        "w1": 0.1 * jax.random.normal(keys[1], (C, C, KS, KS), jnp.float32),
        "b1": 0.1 * jax.random.normal(keys[2], (C,), jnp.float32),
        "g1": 1.0 + 0.1 * jax.random.normal(keys[3], (C,), jnp.float32),
        "beta1": 0.1 * jax.random.normal(keys[4], (C,), jnp.float32),
        "w2": 0.1 * jax.random.normal(keys[5], (C, C, KS, KS), jnp.float32),
        "b2": 0.1 * jax.random.normal(keys[6], (C,), jnp.float32),
        "g2": 1.0 + 0.1 * jax.random.normal(keys[7], (C,), jnp.float32),
        "beta2": 0.1 * jax.random.normal(keys[8], (C,), jnp.float32),
    }

    # tile_rows=8 -> 2 row tiles per image: exercises the multi-step pipelined
    # grid and the cross-tile (two-pass) BatchNorm reduction.
    out = jax.block_until_ready(
        resblock_forward(x, params, compute_dtype=jnp.bfloat16, tile_rows=8))

    # Reference with the same mixed-precision policy as the kernel (bf16 conv
    # inputs, f32 accumulation, f32 BN math) so the comparison is meaningful.
    ref = jax.block_until_ready(resblock_ref(x, params, jnp.bfloat16))

    assert out.shape == (N, C, H, W)
    max_err = float(jnp.max(jnp.abs(out - ref)))
    assert jnp.allclose(out, ref, atol=1e-2, rtol=1e-2), max_err

    print("KERNEL_OK")
</pallas_src>

<mosaic_0001>
module attributes {stable_mosaic.version = 11 : i64} {
  func.func @_conv_stats_kernel(%arg0: i32, %arg1: i32, %arg2: memref<1x1x10x18x4xbf16, #tpu.memory_space<vmem>>, %arg3: memref<9x4x128xbf16, #tpu.memory_space<vmem>>, %arg4: memref<1x1x2x128xf32, #tpu.memory_space<vmem>>) attributes {dimension_semantics = [#tpu.dimension_semantics<parallel>, #tpu.dimension_semantics<parallel>], iteration_bounds = array<i64: 2, 2>, scalar_prefetch = 0 : i64, scratch_operands = 0 : i64, tpu.core_type = #tpu.core_type<tc>, window_params = [{transform_indices = @transform_0, window_bounds = array<i64: 1, 1, 10, 18, 4>}, {pipeline_mode = #tpu.pipeline_mode<synchronous>, transform_indices = @transform_1, window_bounds = array<i64: 9, 4, 128>}, {transform_indices = @transform_2, window_bounds = array<i64: 1, 1, 2, 128>}]} {
    %c0 = arith.constant 0 : index
    %c0_0 = arith.constant 0 : index
    %c0_1 = arith.constant 0 : index
    %c0_2 = arith.constant 0 : index
    %c0_3 = arith.constant 0 : index
    %0 = vector.load %arg2[%c0, %c0_0, %c0_1, %c0_2, %c0_3] : memref<1x1x10x18x4xbf16, #tpu.memory_space<vmem>>, vector<1x1x10x18x4xbf16>
    %1 = vector.shape_cast %0 : vector<1x1x10x18x4xbf16> to vector<10x18x4xbf16>
    %cst = arith.constant 0.000000e+00 : f32
    %2 = vector.broadcast %cst : f32 to vector<128x128xf32>
    %3 = vector.extract_strided_slice %1 {offsets = [0, 0, 0], sizes = [8, 16, 4], strides = [1, 1, 1]} : vector<10x18x4xbf16> to vector<8x16x4xbf16>
    %4 = vector.shape_cast %3 : vector<8x16x4xbf16> to vector<128x4xbf16>
    %c0_4 = arith.constant 0 : index
    %c0_5 = arith.constant 0 : index
    %c0_6 = arith.constant 0 : index
    %5 = vector.load %arg3[%c0_4, %c0_5, %c0_6] : memref<9x4x128xbf16, #tpu.memory_space<vmem>>, vector<1x4x128xbf16>
    %6 = vector.shape_cast %5 : vector<1x4x128xbf16> to vector<4x128xbf16>
    %cst_7 = arith.constant dense<0.000000e+00> : vector<128x128xf32>
    %7 = tpu.matmul %4, %6, %cst_7 {dimension_numbers = #tpu.dot_dimension_numbers<[1], [0], [0], [1], [0, 0, 1, 1], [], []>} : vector<128x4xbf16>, vector<4x128xbf16>, vector<128x128xf32> -> vector<128x128xf32>
    %8 = arith.addf %2, %7 : vector<128x128xf32>
    %9 = vector.extract_strided_slice %1 {offsets = [0, 1, 0], sizes = [8, 16, 4], strides = [1, 1, 1]} : vector<10x18x4xbf16> to vector<8x16x4xbf16>
    %10 = vector.shape_cast %9 : vector<8x16x4xbf16> to vector<128x4xbf16>
    %c1 = arith.constant 1 : index
    %c0_8 = arith.constant 0 : index
    %c0_9 = arith.constant 0 : index
    %11 = vector.load %arg3[%c1, %c0_8, %c0_9] : memref<9x4x128xbf16, #tpu.memory_space<vmem>>, vector<1x4x128xbf16>
    %12 = vector.shape_cast %11 : vector<1x4x128xbf16> to vector<4x128xbf16>
    %cst_10 = arith.constant dense<0.000000e+00> : vector<128x128xf32>
    %13 = tpu.matmul %10, %12, %cst_10 {dimension_numbers = #tpu.dot_dimension_numbers<[1], [0], [0], [1], [0, 0, 1, 1], [], []>} : vector<128x4xbf16>, vector<4x128xbf16>, vector<128x128xf32> -> vector<128x128xf32>
    %14 = arith.addf %8, %13 : vector<128x128xf32>
    %15 = vector.extract_strided_slice %1 {offsets = [0, 2, 0], sizes = [8, 16, 4], strides = [1, 1, 1]} : vector<10x18x4xbf16> to vector<8x16x4xbf16>
    %16 = vector.shape_cast %15 : vector<8x16x4xbf16> to vector<128x4xbf16>
    %c2 = arith.constant 2 : index
    %c0_11 = arith.constant 0 : index
    %c0_12 = arith.constant 0 : index
    %17 = vector.load %arg3[%c2, %c0_11, %c0_12] : memref<9x4x128xbf16, #tpu.memory_space<vmem>>, vector<1x4x128xbf16>
    %18 = vector.shape_cast %17 : vector<1x4x128xbf16> to vector<4x128xbf16>
    %cst_13 = arith.constant dense<0.000000e+00> : vector<128x128xf32>
    %19 = tpu.matmul %16, %18, %cst_13 {dimension_numbers = #tpu.dot_dimension_numbers<[1], [0], [0], [1], [0, 0, 1, 1], [], []>} : vector<128x4xbf16>, vector<4x128xbf16>, vector<128x128xf32> -> vector<128x128xf32>
    %20 = arith.addf %14, %19 : vector<128x128xf32>
    %21 = vector.extract_strided_slice %1 {offsets = [1, 0, 0], sizes = [8, 16, 4], strides = [1, 1, 1]} : vector<10x18x4xbf16> to vector<8x16x4xbf16>
    %22 = vector.shape_cast %21 : vector<8x16x4xbf16> to vector<128x4xbf16>
    %c3 = arith.constant 3 : index
    %c0_14 = arith.constant 0 : index
    %c0_15 = arith.constant 0 : index
    %23 = vector.load %arg3[%c3, %c0_14, %c0_15] : memref<9x4x128xbf16, #tpu.memory_space<vmem>>, vector<1x4x128xbf16>
    %24 = vector.shape_cast %23 : vector<1x4x128xbf16> to vector<4x128xbf16>
    %cst_16 = arith.constant dense<0.000000e+00> : vector<128x128xf32>
    %25 = tpu.matmul %22, %24, %cst_16 {dimension_numbers = #tpu.dot_dimension_numbers<[1], [0], [0], [1], [0, 0, 1, 1], [], []>} : vector<128x4xbf16>, vector<4x128xbf16>, vector<128x128xf32> -> vector<128x128xf32>
    %26 = arith.addf %20, %25 : vector<128x128xf32>
    %27 = vector.extract_strided_slice %1 {offsets = [1, 1, 0], sizes = [8, 16, 4], strides = [1, 1, 1]} : vector<10x18x4xbf16> to vector<8x16x4xbf16>
    %28 = vector.shape_cast %27 : vector<8x16x4xbf16> to vector<128x4xbf16>
    %c4 = arith.constant 4 : index
    %c0_17 = arith.constant 0 : index
    %c0_18 = arith.constant 0 : index
    %29 = vector.load %arg3[%c4, %c0_17, %c0_18] : memref<9x4x128xbf16, #tpu.memory_space<vmem>>, vector<1x4x128xbf16>
    %30 = vector.shape_cast %29 : vector<1x4x128xbf16> to vector<4x128xbf16>
    %cst_19 = arith.constant dense<0.000000e+00> : vector<128x128xf32>
    %31 = tpu.matmul %28, %30, %cst_19 {dimension_numbers = #tpu.dot_dimension_numbers<[1], [0], [0], [1], [0, 0, 1, 1], [], []>} : vector<128x4xbf16>, vector<4x128xbf16>, vector<128x128xf32> -> vector<128x128xf32>
    %32 = arith.addf %26, %31 : vector<128x128xf32>
    %33 = vector.extract_strided_slice %1 {offsets = [1, 2, 0], sizes = [8, 16, 4], strides = [1, 1, 1]} : vector<10x18x4xbf16> to vector<8x16x4xbf16>
    %34 = vector.shape_cast %33 : vector<8x16x4xbf16> to vector<128x4xbf16>
    %c5 = arith.constant 5 : index
    %c0_20 = arith.constant 0 : index
    %c0_21 = arith.constant 0 : index
    %35 = vector.load %arg3[%c5, %c0_20, %c0_21] : memref<9x4x128xbf16, #tpu.memory_space<vmem>>, vector<1x4x128xbf16>
    %36 = vector.shape_cast %35 : vector<1x4x128xbf16> to vector<4x128xbf16>
    %cst_22 = arith.constant dense<0.000000e+00> : vector<128x128xf32>
    %37 = tpu.matmul %34, %36, %cst_22 {dimension_numbers = #tpu.dot_dimension_numbers<[1], [0], [0], [1], [0, 0, 1, 1], [], []>} : vector<128x4xbf16>, vector<4x128xbf16>, vector<128x128xf32> -> vector<128x128xf32>
    %38 = arith.addf %32, %37 : vector<128x128xf32>
    %39 = vector.extract_strided_slice %1 {offsets = [2, 0, 0], sizes = [8, 16, 4], strides = [1, 1, 1]} : vector<10x18x4xbf16> to vector<8x16x4xbf16>
    %40 = vector.shape_cast %39 : vector<8x16x4xbf16> to vector<128x4xbf16>
    %c6 = arith.constant 6 : index
    %c0_23 = arith.constant 0 : index
    %c0_24 = arith.constant 0 : index
    %41 = vector.load %arg3[%c6, %c0_23, %c0_24] : memref<9x4x128xbf16, #tpu.memory_space<vmem>>, vector<1x4x128xbf16>
    %42 = vector.shape_cast %41 : vector<1x4x128xbf16> to vector<4x128xbf16>
    %cst_25 = arith.constant dense<0.000000e+00> : vector<128x128xf32>
    %43 = tpu.matmul %40, %42, %cst_25 {dimension_numbers = #tpu.dot_dimension_numbers<[1], [0], [0], [1], [0, 0, 1, 1], [], []>} : vector<128x4xbf16>, vector<4x128xbf16>, vector<128x128xf32> -> vector<128x128xf32>
    %44 = arith.addf %38, %43 : vector<128x128xf32>
    %45 = vector.extract_strided_slice %1 {offsets = [2, 1, 0], sizes = [8, 16, 4], strides = [1, 1, 1]} : vector<10x18x4xbf16> to vector<8x16x4xbf16>
    %46 = vector.shape_cast %45 : vector<8x16x4xbf16> to vector<128x4xbf16>
    %c7 = arith.constant 7 : index
    %c0_26 = arith.constant 0 : index
    %c0_27 = arith.constant 0 : index
    %47 = vector.load %arg3[%c7, %c0_26, %c0_27] : memref<9x4x128xbf16, #tpu.memory_space<vmem>>, vector<1x4x128xbf16>
    %48 = vector.shape_cast %47 : vector<1x4x128xbf16> to vector<4x128xbf16>
    %cst_28 = arith.constant dense<0.000000e+00> : vector<128x128xf32>
    %49 = tpu.matmul %46, %48, %cst_28 {dimension_numbers = #tpu.dot_dimension_numbers<[1], [0], [0], [1], [0, 0, 1, 1], [], []>} : vector<128x4xbf16>, vector<4x128xbf16>, vector<128x128xf32> -> vector<128x128xf32>
    %50 = arith.addf %44, %49 : vector<128x128xf32>
    %51 = vector.extract_strided_slice %1 {offsets = [2, 2, 0], sizes = [8, 16, 4], strides = [1, 1, 1]} : vector<10x18x4xbf16> to vector<8x16x4xbf16>
    %52 = vector.shape_cast %51 : vector<8x16x4xbf16> to vector<128x4xbf16>
    %c8 = arith.constant 8 : index
    %c0_29 = arith.constant 0 : index
    %c0_30 = arith.constant 0 : index
    %53 = vector.load %arg3[%c8, %c0_29, %c0_30] : memref<9x4x128xbf16, #tpu.memory_space<vmem>>, vector<1x4x128xbf16>
    %54 = vector.shape_cast %53 : vector<1x4x128xbf16> to vector<4x128xbf16>
    %cst_31 = arith.constant dense<0.000000e+00> : vector<128x128xf32>
    %55 = tpu.matmul %52, %54, %cst_31 {dimension_numbers = #tpu.dot_dimension_numbers<[1], [0], [0], [1], [0, 0, 1, 1], [], []>} : vector<128x4xbf16>, vector<4x128xbf16>, vector<128x128xf32> -> vector<128x128xf32>
    %56 = arith.addf %50, %55 : vector<128x128xf32>
    %cst_32 = arith.constant dense<0.000000e+00> : vector<128xf32>
    %57 = vector.multi_reduction <add>, %56, %cst_32 [0] : vector<128x128xf32> to vector<128xf32>
    %58 = vector.shape_cast %57 : vector<128xf32> to vector<1x128xf32>
    %c0_33 = arith.constant 0 : index
    %c0_34 = arith.constant 0 : index
    %c0_35 = arith.constant 0 : index
    %c0_36 = arith.constant 0 : index
    %59 = vector.load %arg4[%c0_33, %c0_34, %c0_35, %c0_36] : memref<1x1x2x128xf32, #tpu.memory_space<vmem>>, vector<1x1x1x128xf32>
    %60 = vector.shape_cast %59 : vector<1x1x1x128xf32> to vector<1x128xf32>
    %61 = vector.shape_cast %58 : vector<1x128xf32> to vector<1x1x1x128xf32>
    tpu.vector_store %arg4[%c0_33, %c0_34, %c0_35, %c0_36], %61 {strides = array<i32>} : memref<1x1x2x128xf32, #tpu.memory_space<vmem>>, vector<1x1x1x128xf32>,
    %62 = arith.mulf %56, %56 : vector<128x128xf32>
    %cst_37 = arith.constant dense<0.000000e+00> : vector<128xf32>
    %63 = vector.multi_reduction <add>, %62, %cst_37 [0] : vector<128x128xf32> to vector<128xf32>
    %64 = vector.shape_cast %63 : vector<128xf32> to vector<1x128xf32>
    %c0_38 = arith.constant 0 : index
    %c0_39 = arith.constant 0 : index
    %c1_40 = arith.constant 1 : index
    %c0_41 = arith.constant 0 : index
    %65 = vector.load %arg4[%c0_38, %c0_39, %c1_40, %c0_41] : memref<1x1x2x128xf32, #tpu.memory_space<vmem>>, vector<1x1x1x128xf32>
    %66 = vector.shape_cast %65 : vector<1x1x1x128xf32> to vector<1x128xf32>
    %67 = vector.shape_cast %64 : vector<1x128xf32> to vector<1x1x1x128xf32>
    tpu.vector_store %arg4[%c0_38, %c0_39, %c1_40, %c0_41], %67 {strides = array<i32>} : memref<1x1x2x128xf32, #tpu.memory_space<vmem>>, vector<1x1x1x128xf32>,
    return
  }
  func.func @transform_0(%arg0: i32, %arg1: i32) -> (i32, i32, i32, i32, i32) {
    %c0_i32 = arith.constant 0 : i32
    %c0_i32_0 = arith.constant 0 : i32
    %c0_i32_1 = arith.constant 0 : i32
    %c0_i32_2 = arith.constant 0 : i32
    return %arg0, %arg1, %c0_i32, %c0_i32_0, %c0_i32_1 : i32, i32, i32, i32, i32
  }
  func.func @transform_1(%arg0: i32, %arg1: i32) -> (i32, i32, i32) {
    %c0_i32 = arith.constant 0 : i32
    %c0_i32_0 = arith.constant 0 : i32
    %c0_i32_1 = arith.constant 0 : i32
    %c0_i32_2 = arith.constant 0 : i32
    return %c0_i32, %c0_i32_0, %c0_i32_1 : i32, i32, i32
  }
  func.func @transform_2(%arg0: i32, %arg1: i32) -> (i32, i32, i32, i32) {
    %c0_i32 = arith.constant 0 : i32
    %c0_i32_0 = arith.constant 0 : i32
    %c0_i32_1 = arith.constant 0 : i32
    return %arg0, %arg1, %c0_i32, %c0_i32_0 : i32, i32, i32, i32
  }
}

</mosaic_0001>

<bundles_post_ra>
// kernel: tpu_custom_call.1
= control target key start
LH: loop header
LB: loop body
LE: loop exit
PB: predicated region body
PF: predicated region fallthrough
CT: control target
= control target key end

     0   :  { %7 = vsyncpa [#allocation3], 0  ;;  %s3304_s0 = inlined_call_operand.vmem [shape: bf16[2,2,10,18,4], index: 0, kind: input, shape index: {}]   ;;  %s3305_s1 = inlined_call_operand.vmem [shape: bf16[9,4,128], index: 1, kind: input, shape index: {}]   ;;  %s3306_s2 = inlined_call_operand.hbm [shape: f32[2,2,2,128], index: 2, kind: output, shape index: {}]  }
   0x1   :  { %9 = vsyncpa [#allocation3 + $0x1], 0  ;;  %s2625_s9 = smov 0   ;;  %s2627_s10 = smov 0  }
   0x2   :  { %s2629_s11 = smov 0   ;;  %s2631_s12 = smov 0  }
   0x3   :  { %s2633_s13 = smov 0   ;;  %s2635_s14 = smov 0  }
   0x4   :  { %s2637_s15 = smov 0   ;;  %s2639_s16 = smov 0  }
   0x5 LB: > { %s1915_s17 = sadd.s32 4294967295, %s2607_s16   ;;  %s1916_s18 = sadd.s32 4294967294, %s2607_s16   ;;  %s2607_s16 = sphi %s2639_s16, %s15_s16   ;;  %s2603_s15 = sphi %s2637_s15, %s3319_s15   ;;  %s2599_s14 = sphi %s2635_s14, %s3318_s14   ;;  %s2595_s13 = sphi %s2633_s13, %s3317_s13   ;;  %s2591_s12 = sphi %s2631_s12, %s3316_s12   ;;  %s2587_s11 = sphi %s2629_s11, %s3315_s11   ;;  %s2583_s10 = sphi %s2627_s10, %s3314_s10   ;;  %s2579_s9 = sphi %s2625_s9, %s3313_s9  }
   0x6   : > { %s24_s19 = sadd.s32 1, %s2599_s14  ;;  %s27_s20 = sadd.s32 1, %s2603_s15 }
   0x7   : > { %p25_p0 = scmp.ge.s32.totalorder %s24_s19, 2  ;;  %p95_p1 = scmp.ne.s32.totalorder %s2587_s11, %s2583_s10 }
   0x8   : > { %p96_p2 = scmp.eq.s32.totalorder %s1915_s17, 3  ;;  %p101_p5 = scmp.ne.s32.totalorder %s2583_s10, %s2579_s9 }
   0x9   : > { %s3321_s19 = smov (%p25_p0, %s24_s19), 0  ;;  %s3323_s20 = smov (!%p25_p0, %s27_s20), %s2603_s15 }
   0xa   : > { %s81_s21 = ssub.s32 %s2599_s14, %s3321_s19  ;;  %p2676_p3 = por %p96_p2, %p95_p1 }
   0xb   : > { %p29_p4 = scmp.ge.s32.totalorder %s3323_s20, 2  ;;  %p102_p6 = scmp.eq.s32.totalorder %s1916_s18, 3 }
   0xc   : > { %p1919_p7 = scmp.ge.s32.totalorder %s2607_s16, 1  ;;  %p135_p9 = scmp.lt.s32.totalorder %s2607_s16, 5 }
   0xd   : > { %s3325_s20 = smov (%p29_p4, %s3323_s20), 0  ;;  %p2685_p8 = por %p102_p6, %p101_p5 }
   0xe   : > { %s80_s24 = ssub.s32 %s2603_s15, %s3325_s20  ;;  %s85_s25 = sadd.s32 1, %s2587_s11 }
   0xf   : > { %s82_s26 = sor.u32 %s81_s21, %s80_s24  ;;  %p136_p10 = pnand %p1919_p7, %p135_p9 }
  0x10   : > { %p83_p11 = scmp.eq.s32.totalorder %s82_s26, 0  ;;  %v1922_v0 = vld [vmem:[%s3305_s1 + $0x2] sm:$0x3] (!%p136_p10)  ;;  %vm448_vm0 = vcmask (!%p136_p10), 1041408   ;;  %v2702_v1 = vld [vmem:[%s3305_s1 + $0x8] sm:$0x3] (!%p136_p10) }
  0x11   : > { %139 = sbr.rel (%p136_p10) target bundleno = 442 (0x1ba), region = 28  ;;  %p161_p12 = scmp.lt.s32.totalorder (!%p136_p10), %s2595_s13, 1  ;;  %2420 = vmatprep.subr.msk.bf16.mxu1 (!%p136_p10), %vm448_vm0, %v1922_v0  ;;  %2424 = vmatprep.subr.msk.bf16.mxu0 (!%p136_p10), %vm448_vm0, %v2702_v1  ;;  %v450_v2 = vsel (!%p136_p10), %vm448_vm0, %v1922_v0, 0  ;;  %v2711_v3 = vsel (!%p136_p10), %vm448_vm0, %v2702_v1, 0  ;;  %v201_v4 = vld [vmem:[%s3305_s1] sm:$0x3] (!%p136_p10) }
  0x12   : > { %s2694_s27 = scalar_select %p83_p11, %s2587_s11, %s85_s25  }
  0x13   : > { %p163_p13 = scmp.lt.s32.totalorder (!%p136_p10), %s2591_s12, 1  ;;  %2129 = vmatpush3.bf16.msra.mxu1 (!%p136_p10), %v450_v2  ;;  %2201 = vmatpush3.bf16.msra.mxu0 (!%p136_p10), %v2711_v3  ;;  %v2001_v5 = vld [vmem:[%s3305_s1 + $0xa] sm:$0x3] (!%p136_p10)  ;;  %vm202_vm1 = vsmask.f32 (!%p136_p10), 3328  ;;  %v2731_v6 = vsel (!%p136_p10), %vm448_vm0, %v201_v4, 0 }
  0x14   : > { %2421 = vmatprep.subr.msk.bf16.mxu1 (!%p136_p10), %vm448_vm0, %v201_v4  ;;  %2426 = vmatprep.subr.msk.bf16.mxu0 (!%p136_p10), %vm448_vm0, %v2001_v5  ;;  %vm203_vm2 = vsmask.f32 (!%p136_p10), 7440  ;;  %vm423_vm3 = vcmask (!%p136_p10), 31744   ;;  %v2757_v18 = vsel (!%p136_p10), %vm448_vm0, %v2001_v5, 0  ;;  %v2762_v23 = vld [vmem:[%s3305_s1 + $0xc] sm:$0x3] (!%p136_p10) }
  0x15   : > { %vm2774_vm4 = vmor (!%p136_p10), %vm202_vm1, %vm203_vm2  ;;  %v2783_v38 = vsel (!%p136_p10), %vm448_vm0, %v2762_v23, 0  ;;  %vm721_vm5 = vcmask (!%p136_p10), 1042432   ;;  %vm722_vm6 = vcmask (!%p136_p10), 1046532   ;;  %s2043_s26 = sshll.u32 (!%p136_p10), %s2595_s13, 1 }
  0x16   : > { %vm2857_vm7 = vmor (!%p136_p10), %vm721_vm5, %vm722_vm6  ;;  %s1830_s28 = sadd.s32 (!%p136_p10), %s2591_s12, %s2043_s26 }
  0x18   : > { %s162_s4 = scalar_select %p161_p12, %s2595_s13, 1 }
  0x19   : > { %s164_s7 = scalar_select %p163_p13, %s2591_s12, 1 }
  0x1a   : > { %s2431_s18 = smul.u32 60, %s162_s4 }
  0x1b   : > { %s2430_s21 = smul.u32 30, %s164_s7  ;;  %s2609_s7 = smov [#allocation2]  }
  0x1c   : > { %s2517_s8 = sshll.u32 %s2609_s7, 4  ;;  %s2518_s8 = int_to_ptr.vmem [resolvable:$false] %s2517_s8 }
  0x1d   : > { %s167_s24 = sadd.s32 %s2431_s18, %s2430_s21  ;;  %s2519_s17 = scalar_lea.vmem %s2518_s8, 64 }
  0x1e   : > { %s1921_s25 = sshll.u32 %s167_s24, 2  ;;  %s158_s24 = sand.u32 1, %s2583_s10  }
  0x1f   : > { %s2728_s29 = scalar_lea.vmem %s3304_s0, %s1921_s25  ;;  %s1920_s25 = sshll.u32 %s158_s24, 1 }
  0x20   : > { %v2734_v7 = vld [vmem:[%s2728_s29] sm:$0xf]  ;;  %v2737_v8 = vld [vmem:[%s2728_s29 + $0x4] sm:$0xf]  ;;  %v2740_v9 = vld [vmem:[%s2728_s29 + $0x8] sm:$0x1] }
  0x21   : > { %v206_v10 = vshrl.u32 %v2734_v7, 16  ;;  %v209_v11 = vshll.u32 %v2734_v7, 16  ;;  %v215_v12 = vshll.u32 %v2737_v8, 16  ;;  %v219_v13 = vshrl.u32 %v2737_v8, 16  ;;  %v2747_v14 = vld [vmem:[%s2728_s29 + $0xc] sm:$0xf] }
  0x22   : > { %v225_v15 = vshll.u32 %v2740_v9, 16  ;;  %v2751_v16 = vld [vmem:[%s2728_s29 + $0x10] sm:$0xf]  ;;  %v2754_v17 = vld [vmem:[%s2728_s29 + $0x14] sm:$0x1]  ;;  %v230_v25 = vshrl.u32 %v2747_v14, 16 }
  0x23   : > { %v208_v19 = vrot.slane %v206_v10, 4  ;;  %v211_v20 = vrot.slane %v209_v11, 5  ;;  %v217_v21 = vrot.slane %v215_v12, 5  ;;  %v221_v22 = vrot.slane %v219_v13, 4  ;;  %v2770_v32 = vld [vmem:[%s2728_s29 + $0x18] sm:$0xf] }
  0x24   : > { %v227_v24 = vrot.slane %v225_v15, 5  ;;  %v233_v26 = vshll.u32 %v2747_v14, 16  ;;  %v239_v27 = vshll.u32 %v2751_v16, 16  ;;  %v243_v30 = vshrl.u32 %v2751_v16, 16  ;;  %v2779_v37 = vld [vmem:[%s2728_s29 + $0x1c] sm:$0xf] }
  0x25   : > { %v212_v28 = vor.u32 %v211_v20, %v208_v19  ;;  %v222_v29 = vor.u32 %v221_v22, %v217_v21  ;;  %v249_v31 = vshll.u32 %v2754_v17, 16  ;;  %v232_v34 = vrot.slane %v230_v25, 4  ;;  %v2787_v45 = vld [vmem:[%s2728_s29 + $0x20] sm:$0x1]  ;;  %v2797_v56 = vld [vmem:[%s2728_s29 + $0x24] sm:$0xf] }
  0x26   : > { %v235_v35 = vrot.slane %v233_v26, 5  ;;  %v241_v36 = vrot.slane %v239_v27, 5  ;;  %v245_v41 = vrot.slane %v243_v30, 4  ;;  %v736_v44 = vrot.slane %v2754_v17, 5  ;;  %v2802_v61 = vld [vmem:[%s2728_s29 + $0x28] sm:$0xf] }
  0x27   : > { %v213_v39 = vrot.slane %v212_v28, 4  ;;  %v223_v40 = vrot.slane %v222_v29, 4  ;;  %v251_v42 = vrot.slane %v249_v31, 5  ;;  %v254_v46 = vshrl.u32 %v2770_v32, 16  ;;  %v2810_v4 = vld [vmem:[%s2728_s29 + $0x2c] sm:$0x1] }
  0x28   : > { %v236_v43 = vor.u32 %v235_v35, %v232_v34  ;;  %v257_v47 = vshll.u32 %v2770_v32, 16  ;;  %v246_v50 = vor.u32 %v245_v41, %v241_v36  ;;  %v263_v51 = vshll.u32 %v2779_v37, 16  ;;  %v2816_v13 = vld [vmem:[%s2728_s29 + $0x30] sm:$0xf]  ;;  %v2823_v22 = vld [vmem:[%s3305_s1 + $0x4] sm:$0x3] }
  0x29   : > { %v218_v48 = vsel %vm2774_vm4, %v213_v39, %v217_v21  ;;  %v228_v49 = vsel %vm2774_vm4, %v223_v40, %v227_v24  ;;  %v256_v54 = vrot.slane %v254_v46, 4  ;;  %v267_v59 = vshrl.u32 %v2779_v37, 16  ;;  %v2828_v28 = vld [vmem:[%s2728_s29 + $0x34] sm:$0xf]  ;;  %v2835_v34 = vld [vmem:[%s2728_s29 + $0x38] sm:$0x1] }
  0x2a   : > { %v1923_v52 = vcombine.low %v218_v48, %v228_v49  ;;  %v237_v53 = vrot.slane %v236_v43, 4  ;;  %v259_v55 = vrot.slane %v257_v47, 5  ;;  %v247_v57 = vrot.slane %v246_v50, 4  ;;  %s160_s30 = scalar_lea.vmem [#allocation2], %s1920_s25  ;;  %s1819_s12 = scalar_lea.sflag [#allocation3], %s158_s24 }
  0x2b   : > { %v265_v58 = vrot.slane %v263_v51, 5  ;;  %v273_v60 = vshll.u32 %v2787_v45, 16  ;;  %v740_v0 = vrot.slane %v2779_v37, 5  ;;  %v743_v2 = vrot.slane %v2787_v45, 5  ;;  %v2848_v51 = vld [vmem:[%s2728_s29 + $0x3c] sm:$0xf] }
  0x2c   : > { %2130 = vmatprep.mubr.msk.bf16.mxu1 %vm423_vm3, %v1923_v52  ;;  %v242_v62 = vsel %vm2774_vm4, %v237_v53, %v241_v36  ;;  %v260_v63 = vor.u32 %v259_v55, %v256_v54  ;;  %v252_v5 = vsel %vm2774_vm4, %v247_v57, %v251_v42  ;;  %v269_v10 = vrot.slane %v267_v59, 4  ;;  %v2853_v57 = vld [vmem:[%s2728_s29 + $0x40] sm:$0xf]  ;;  %s1834_s3 = sshll.u32 %s160_s30, 4  ;;  %s3253_s3 = int_to_ptr.vmem [resolvable:$true] %s1834_s3 }
  0x2d   : > { %v275_v11 = vrot.slane %v273_v60, 5  ;;  %v278_v12 = vshrl.u32 %v2797_v56, 16  ;;  %v1924_v15 = vcombine.low %v242_v62, %v252_v5  ;;  %v281_v20 = vshll.u32 %v2797_v56, 16  ;;  %s2513_s13 = scalar_lea.vmem %s3253_s3, 32  ;;  %p2520_p4 = scmp.lt.s32.totalorder %s3253_s3, %s2518_s8 }
  0x2e   : > { %v261_v19 = vrot.slane %v260_v63, 4  ;;  %v287_v21 = vshll.u32 %v2802_v61, 16  ;;  %v270_v24 = vor.u32 %v269_v10, %v265_v58  ;;  %v291_v26 = vshrl.u32 %v2802_v61, 16  ;;  %p2514_p0 = scmp.ne.s32.totalorder %s3253_s3, %s2513_s13  ;;  %p2521_p5 = scmp.lt.s32.totalorder %s2519_s17, %s2513_s13 }
  0x2f   : > { %v280_v25 = vrot.slane %v278_v12, 4  ;;  %v297_v27 = vshll.u32 %v2810_v4, 16  ;;  %2202 = vmatprep.mubr.msk.bf16.mxu0 %vm423_vm3, %v1924_v15  ;;  %2131 = vmatmul.mubr.msk.bf16.vlgmr.msra.gmra.mrb[0].mxu1 %vm423_vm3, %v1924_v15  ;;  %v283_v30 = vrot.slane %v281_v20, 5  ;;  %v302_v35 = vshrl.u32 %v2816_v13, 16  ;;  %v2874_v20 = vld [vmem:[%s2728_s29 + $0x44] sm:$0x1] }
  0x30   : > { %v266_v29 = vsel %vm2774_vm4, %v261_v19, %v265_v58  ;;  %v289_v31 = vrot.slane %v287_v21, 5  ;;  %2147 = vmatpush3.bf16.msra.mxu1 %v2731_v6  ;;  %v271_v36 = vrot.slane %v270_v24, 4  ;;  %v293_v39 = vrot.slane %v291_v26, 4  ;;  %p2515_p1 = pnand %p2514_p0, %p2676_p3  ;;  %p2522_p6 = por %p2521_p5, %p2520_p4 }
  0x31   : > { %v299_v40 = vrot.slane %v297_v27, 5  ;;  %v305_v41 = vshll.u32 %v2816_v13, 16  ;;  %v284_v42 = vor.u32 %v283_v30, %v280_v25  ;;  %v304_v43 = vrot.slane %v302_v35, 4  ;;  %2422 = vmatprep.subr.msk.bf16.mxu1 %vm448_vm0, %v2823_v22 }
  0x32   : > { %v311_v46 = vshll.u32 %v2828_v28, 16  ;;  %v315_v47 = vshrl.u32 %v2828_v28, 16  ;;  %v276_v48 = vsel %vm2774_vm4, %v271_v36, %v275_v11  ;;  %v294_v49 = vor.u32 %v293_v39, %v289_v31  ;;  %v2887_v36 = vld [vmem:[%s2728_s29 + $0x48] sm:$0xf]  ;;  %p2516_p2 = pneg %p2515_p1 }
  0x33   : > { %v307_v6 = vrot.slane %v305_v41, 5  ;;  %v321_v50 = vshll.u32 %v2835_v34, 16  ;;  %v2850_v52 = vcombine.low %v266_v29, %v276_v48  ;;  %v285_v53 = vrot.slane %v284_v42, 4  ;;  %v2902_v42 = vld [vmem:[%s2728_s29 + $0x4c] sm:$0xf] }
  0x34   : > { %v313_v54 = vrot.slane %v311_v46, 5  ;;  %v317_v55 = vrot.slane %v315_v47, 4  ;;  %v295_v58 = vrot.slane %v294_v49, 4  ;;  %v1956_v63 = vrot.slane %v2747_v14, 9  ;;  %p2523_p7 = pnand %p2522_p6, %p2516_p2 }
  0x35   : > { %v308_v59 = vor.u32 %v307_v6, %v304_v43  ;;  %v323_v60 = vrot.slane %v321_v50, 5  ;;  %2203 = vmatmul.mubr.msk.bf16.vlgmr.msra.gmra.mrb[0].mxu0 %vm423_vm3, %v2850_v52  ;;  %2134 = vmatprep.mubr.msk.bf16.mxu1 %vm423_vm3, %v2850_v52  ;;  %v290_v5 = vsel %vm2774_vm4, %v285_v53, %v289_v31  ;;  %v733_v11 = vrot.slane %v2751_v16, 5 }
  0x36   : > { %v318_v10 = vor.u32 %v317_v55, %v313_v54  ;;  %v326_v12 = vshrl.u32 %v2848_v51, 16  ;;  %2219 = vmatpush3.bf16.msra.mxu0 %v2757_v18  ;;  %v300_v15 = vsel %vm2774_vm4, %v295_v58, %v299_v40  ;;  %v329_v21 = vshll.u32 %v2848_v51, 16 }
  0x37   : > { %v309_v19 = vrot.slane %v308_v59, 4  ;;  %v335_v24 = vshll.u32 %v2853_v57, 16  ;;  %v2878_v25 = vcombine.low %v290_v5, %v300_v15  ;;  %v734_v27 = vsel %vm2857_vm7, %v1956_v63, %v733_v11  ;;  %2427 = vmatprep.subr.msk.bf16.mxu0 %vm448_vm0, %v2762_v23 }
  0x38   : > { %v319_v26 = vrot.slane %v318_v10, 4  ;;  %v735_v29 = vrot.slane %v733_v11, 4  ;;  %v328_v30 = vrot.slane %v326_v12, 4  ;;  %v331_v31 = vrot.slane %v329_v21, 5 }
  0x39   : > { %v314_v18 = vsel %vm2774_vm4, %v309_v19, %v313_v54  ;;  %v337_v35 = vrot.slane %v335_v24, 5  ;;  %2206 = vmatprep.mubr.msk.bf16.mxu0 %vm423_vm3, %v2878_v25  ;;  %2135 = vmatmul.mubr.msk.bf16.gmra.mrb[4].mxu1 %vm423_vm3, %v2878_v25  ;;  %v339_v40 = vshrl.u32 %v2853_v57, 16  ;;  %v345_v41 = vshll.u32 %v2874_v20, 16  ;;  %v2919_v54 = vld [vmem:[%s2728_s29 + $0x50] sm:$0x1] }
  0x3a   : > { %v324_v39 = vsel %vm2774_vm4, %v319_v26, %v323_v60  ;;  %v737_v23 = vsel %vm2857_vm7, %v735_v29, %v736_v44  ;;  %v332_v47 = vor.u32 %v331_v31, %v328_v30  ;;  %v1957_v48 = vrot.slane %v2770_v32, 9  ;;  %v2944_v29 = vld [vmem:[%s2728_s29 + $0x58] sm:$0xf] }
  0x3b   : > { %v2904_v43 = vcombine.low %v314_v18, %v324_v39  ;;  %v2906_v46 = vcombine.low %v734_v27, %v737_v23  ;;  %v341_v49 = vrot.slane %v339_v40, 4  ;;  %v347_v17 = vrot.slane %v345_v41, 5  ;;  %v2950_v39 = vld [vmem:[%s2728_s29 + $0x5c] sm:$0x1] }
  0x3c   : > { %v742_v6 = vrot.slane %v740_v0, 4  ;;  %v350_v44 = vshrl.u32 %v2887_v36, 16  ;;  %v333_v50 = vrot.slane %v332_v47, 4  ;;  %v741_v53 = vsel %vm2857_vm7, %v1957_v48, %v740_v0  ;;  %v2931_v0 = vld [vmem:[%s2728_s29 + $0x54] sm:$0xf] }
  0x3d   : > { %2138 = vmatprep.mubr.msk.bf16.mxu1 %vm423_vm3, %v2904_v43  ;;  %v353_v55 = vshll.u32 %v2887_v36, 16  ;;  %v359_v58 = vshll.u32 %v2902_v42, 16  ;;  %2207 = vmatmul.mubr.msk.bf16.gmra.mrb[4].mxu0 %vm423_vm3, %v2904_v43  ;;  %v342_v59 = vor.u32 %v341_v49, %v337_v35  ;;  %v363_v5 = vshrl.u32 %v2902_v42, 16 }
  0x3e   : > { %v744_v60 = vsel %vm2857_vm7, %v742_v6, %v743_v2  ;;  %v352_v63 = vrot.slane %v350_v44, 4  ;;  %2220 = vmatprep.mubr.msk.bf16.mxu0 %vm423_vm3, %v2906_v46  ;;  %v338_v10 = vsel %vm2774_vm4, %v333_v50, %v337_v35  ;;  %v369_v2 = vshll.u32 %v2919_v54, 16 }
  0x3f   : > { %v2937_v11 = vcombine.low %v741_v53, %v744_v60  ;;  %v355_v12 = vrot.slane %v353_v55, 5  ;;  %v361_v45 = vrot.slane %v359_v58, 5  ;;  %v343_v15 = vrot.slane %v342_v59, 4  ;;  %v2969_v58 = vld [vmem:[%s3305_s1 + $0xe] sm:$0x3] }
  0x40   : > { %v365_v19 = vrot.slane %v363_v5, 4  ;;  %v1958_v21 = vrot.slane %v2797_v56, 9  ;;  %v747_v26 = vrot.slane %v2802_v61, 5  ;;  %v750_v27 = vrot.slane %v2810_v4, 5 }
  0x41   : > { %v356_v24 = vor.u32 %v355_v12, %v352_v63  ;;  %v374_v18 = vshrl.u32 %v2931_v0, 16  ;;  %v348_v30 = vsel %vm2774_vm4, %v343_v15, %v347_v17  ;;  %v371_v35 = vrot.slane %v369_v2, 5 }
  0x42   : > { %v366_v31 = vor.u32 %v365_v19, %v361_v45  ;;  %v377_v23 = vshll.u32 %v2931_v0, 16  ;;  %v2953_v40 = vcombine.low %v338_v10, %v348_v30  ;;  %v748_v47 = vsel %vm2857_vm7, %v1958_v21, %v747_v26 }
  0x43   : > { %v357_v41 = vrot.slane %v356_v24, 4  ;;  %v749_v4 = vrot.slane %v747_v26, 4  ;;  %v376_v49 = vrot.slane %v374_v18, 4  ;;  %v383_v44 = vshll.u32 %v2944_v29, 16 }
  0x44   : > { %v367_v48 = vrot.slane %v366_v31, 4  ;;  %v379_v6 = vrot.slane %v377_v23, 5  ;;  %2139 = vmatmul.mubr.msk.bf16.gmra.mrb[8].mxu1 %vm423_vm3, %v2953_v40  ;;  %v387_v53 = vshrl.u32 %v2944_v29, 16  ;;  %v393_v55 = vshll.u32 %v2950_v39, 16 }
  0x45   : > { %v362_v17 = vsel %vm2774_vm4, %v357_v41, %v361_v45  ;;  %v751_v50 = vsel %vm2857_vm7, %v749_v4, %v750_v27  ;;  %2221 = vmatmul.mubr.msk.bf16.vlgmr.msra.gmra.mrb[0].mxu0 %vm423_vm3, %v2937_v11  ;;  %v385_v5 = vrot.slane %v383_v44, 5  ;;  %v1959_v45 = vrot.slane %v2816_v13, 9 }
  0x46   : > { %v372_v59 = vsel %vm2774_vm4, %v367_v48, %v371_v35  ;;  %v2975_v60 = vcombine.low %v748_v47, %v751_v50  ;;  %v380_v63 = vor.u32 %v379_v6, %v376_v49  ;;  %2237 = vmatpush3.bf16.msra.mxu0 %v2783_v38  ;;  %v389_v12 = vrot.slane %v387_v53, 4  ;;  %v3013_v53 = vld [vmem:[%s2728_s29 + $0x64] sm:$0xf] }
  0x47   : > { %v2978_v10 = vcombine.low %v362_v17, %v372_v59  ;;  %v754_v19 = vrot.slane %v2828_v28, 5  ;;  %v757_v2 = vrot.slane %v2835_v34, 5  ;;  %v1960_v21 = vrot.slane %v2848_v51, 9  ;;  %2428 = vmatprep.subr.msk.bf16.mxu0 %vm448_vm0, %v2969_v58 }
  0x48   : > { %2224 = vmatprep.mubr.msk.bf16.mxu0 %vm423_vm3, %v2975_v60  ;;  %v381_v15 = vrot.slane %v380_v63, 4  ;;  %v390_v38 = vor.u32 %v389_v12, %v385_v5  ;;  %v395_v24 = vrot.slane %v393_v55, 5  ;;  %v761_v26 = vrot.slane %v2853_v57, 5 }
  0x49   : > { %2142 = vmatprep.mubr.msk.bf16.mxu1 %vm423_vm3, %v2978_v10  ;;  %v764_v27 = vrot.slane %v2874_v20, 5  ;;  %v755_v18 = vsel %vm2857_vm7, %v1959_v45, %v754_v19  ;;  %v756_v30 = vrot.slane %v754_v19, 4  ;;  %v1939_v34 = vcombine.low %v2734_v7, %v2737_v8  ;;  %v3035_v19 = vld [vmem:[%s2728_s29 + $0x68] sm:$0x1] }
  0x4a   : > { %v768_v31 = vrot.slane %v2902_v42, 5  ;;  %v386_v35 = vsel %vm2774_vm4, %v381_v15, %v385_v5  ;;  %v391_v23 = vrot.slane %v390_v38, 4  ;;  %v762_v41 = vsel %vm2857_vm7, %v1960_v21, %v761_v26  ;;  %v3024_v5 = vld [vmem:[%s2728_s29 + $0x60] sm:$0xf] }
  0x4b   : > { %v763_v47 = vrot.slane %v761_v26, 4  ;;  %v758_v20 = vsel %vm2857_vm7, %v756_v30, %v757_v2  ;;  %v1961_v4 = vrot.slane %v2887_v36, 9  ;;  %v771_v49 = vrot.slane %v2919_v54, 5 }
  0x4c   : > { %v770_v48 = vrot.slane %v768_v31, 4  ;;  %v396_v6 = vsel %vm2774_vm4, %v391_v23, %v395_v24  ;;  %v3007_v44 = vcombine.low %v755_v18, %v758_v20  ;;  %v1962_v50 = vrot.slane %v2931_v0, 9  ;;  %v3060_v23 = vld [vmem:[%s2728_s29 + $0x70] sm:$0xf] }
  0x4d   : > { %v765_v17 = vsel %vm2857_vm7, %v763_v47, %v764_v27  ;;  %v3015_v55 = vcombine.low %v386_v35, %v396_v6  ;;  %v775_v63 = vrot.slane %v2944_v29, 5  ;;  %v778_v54 = vrot.slane %v2950_v39, 5 }
  0x4e   : > { %v3017_v59 = vcombine.low %v762_v41, %v765_v17  ;;  %2225 = vmatmul.mubr.msk.bf16.gmra.mrb[4].mxu0 %vm423_vm3, %v3007_v44  ;;  %v769_v12 = vsel %vm2857_vm7, %v1961_v4, %v768_v31  ;;  %v772_v45 = vsel %vm2857_vm7, %v770_v48, %v771_v49  ;;  %v1223_v39 = vrot.slane %v3013_v53, 5  ;;  %v200_v49 = vld [vmem:[%s2728_s29 + $0x74] sm:$0x1] }
  0x4f   : > { %2143 = vmatmul.mubr.msk.bf16.gmra.mrb[12].mxu1 %vm423_vm3, %v3015_v55  ;;  %v777_v15 = vrot.slane %v775_v63, 4  ;;  %v776_v2 = vsel %vm2857_vm7, %v1962_v50, %v775_v63  ;;  %v729_v21 = vrot.slane %v2740_v9, 5  ;;  %v2000_v24 = vrot.slane %v3024_v5, 9 }
  0x50   : > { %2228 = vmatprep.mubr.msk.bf16.mxu0 %vm423_vm3, %v3017_v59  ;;  %2148 = vmatprep.mubr.msk.bf16.mxu1 %vm423_vm3, %v1939_v34  ;;  %v1955_v26 = vrot.slane %v2734_v7, 9  ;;  %v3046_v27 = vcombine.low %v769_v12, %v772_v45  ;;  %v1225_v18 = vrot.slane %v1223_v39, 4  ;;  %v1226_v30 = vrot.slane %v3035_v19, 5  ;;  %v3051_v34 = vld [vmem:[%s2728_s29 + $0x6c] sm:$0xf]  ;;  %s2044_s29 = sshll.u32 %s1830_s28, 5 }
  0x51   : > { %v779_v38 = vsel %vm2857_vm7, %v777_v15, %v778_v54  ;;  %v726_v31 = vrot.slane %v2737_v8, 5  ;;  %v3055_v9 = vcombine.low %v2747_v14, %v2751_v16  ;;  %v1479_v7 = vshrl.u32 %v3051_v34, 16  ;;  %s3251_s6 = scalar_lea.hbm %s3306_s2, %s2044_s29 }
  0x52   : > { %v3057_v35 = vcombine.low %v776_v2, %v779_v38  ;;  %v1482_v41 = vshll.u32 %v3051_v34, 16  ;;  %v3066_v47 = vcombine.low %v2770_v32, %v2779_v37  ;;  %v1492_v4 = vshrl.u32 %v3060_v23, 16  ;;  %v1980_v37 = vld [vmem:[%s3305_s1 + $0x6] sm:$0x3] }
  0x53   : > { %v727_v8 = vsel %vm2857_vm7, %v1955_v26, %v726_v31  ;;  %v728_v20 = vrot.slane %v726_v31, 4  ;;  %v831_v14 = vsel %vm448_vm0, %v2823_v22, 0  ;;  %v1224_v16 = vsel %vm2857_vm7, %v2000_v24, %v1223_v39 }
  0x54   : > { %v1227_v48 = vsel %vm2857_vm7, %v1225_v18, %v1226_v30  ;;  %v1481_v6 = vrot.slane %v1479_v7, 4  ;;  %v1484_v17 = vrot.slane %v1482_v41, 5  ;;  %v1488_v63 = vshll.u32 %v3060_v23, 16 }
  0x55   : > { %v730_v32 = vsel %vm2857_vm7, %v728_v20, %v729_v21  ;;  %v1494_v54 = vrot.slane %v1492_v4, 4  ;;  %v3092_v12 = vcombine.low %v1224_v16, %v1227_v48  ;;  %v1498_v45 = vshll.u32 %v200_v49, 16 }
  0x56   : > { %2229 = vmatmul.mubr.msk.bf16.gmra.mrb[8].mxu0 %vm423_vm3, %v3046_v27  ;;  %v1964_v22 = vcombine.low %v727_v8, %v730_v32  ;;  %v1485_v50 = vor.u32 %v1484_v17, %v1481_v6  ;;  %v2031_v15 = vrot.slane %v3051_v34, 9  ;;  %v1490_v2 = vrot.slane %v1488_v63, 5 }
  0x57   : > { %2149 = vmatmul.mubr.msk.bf16.vlgmr.msra.gmra.mrb[0].mxu1 %vm423_vm3, %v3055_v9  ;;  %2232 = vmatprep.mubr.msk.bf16.mxu0 %vm423_vm3, %v3057_v35  ;;  %v1629_v21 = vrot.slane %v3060_v23, 5  ;;  %v1632_v38 = vrot.slane %v200_v49, 5  ;;  %v3099_v24 = vcombine.low %v2797_v56, %v2802_v61  ;;  %v3103_v26 = vcombine.low %v2816_v13, %v2828_v28 }
  0x58   : > { %2165 = vmatpush3.bf16.msra.mxu1 %v831_v14  ;;  %2152 = vmatprep.mubr.msk.bf16.mxu1 %vm423_vm3, %v3066_v47  ;;  %v1486_v39 = vrot.slane %v1485_v50, 4  ;;  %v1500_v18 = vrot.slane %v1498_v45, 5  ;;  %v1495_v31 = vor.u32 %v1494_v54, %v1490_v2  ;;  %v3129_v62 = vcombine.low %v2848_v51, %v2853_v57  ;;  %v2032_v14 = vld [vmem:[%s3305_s1 + $0x10] sm:$0x3] }
  0x59   : > { %2423 = vmatprep.subr.msk.bf16.mxu1 %vm448_vm0, %v1980_v37  ;;  %v3109_v7 = vsel %vm2857_vm7, %v2031_v15, %v1629_v21  ;;  %v1631_v41 = vrot.slane %v1629_v21, 4  ;;  %v1511_v20 = vsel %vm448_vm0, %v2969_v58, 0  ;;  %v3135_v4 = vcombine.low %v2887_v36, %v2902_v42 }
  0x5a   : > { %v1491_v30 = vsel %vm2774_vm4, %v1486_v39, %v1490_v2  ;;  %v1496_v8 = vrot.slane %v1495_v31, 4  ;;  %v1946_v51 = vcombine.low %v2931_v0, %v2944_v29  ;;  %v1981_v57 = vcombine.low %v3024_v5, %v3013_v53 }
  0x5b   : > { %v3115_v56 = vsel %vm2857_vm7, %v1631_v41, %v1632_v38  ;;  %v957_v36 = vsel %vm448_vm0, %v1980_v37, 0  ;;  %v2012_v42 = vcombine.low %v3051_v34, %v3060_v23  ;;  %v1076_v0 = vshll.u32 %v3024_v5, 16 }
  0x5c   : > { %v2033_v61 = vcombine.low %v3109_v7, %v3115_v56  ;;  %v1501_v13 = vsel %vm2774_vm4, %v1496_v8, %v1500_v18  ;;  %v1086_v29 = vshrl.u32 %v3013_v53, 16  ;;  %v1643_v58 = vsel %vm448_vm0, %v2032_v14, 0 }
  0x5d   : > { %v2022_v28 = vcombine.low %v1491_v30, %v1501_v13  ;;  %v1078_v23 = vrot.slane %v1076_v0, 5 }
  0x5e   : > { %2233 = vmatmul.mubr.msk.bf16.gmra.mrb[12].mxu0 %vm423_vm3, %v3092_v12  ;;  %v1088_v48 = vrot.slane %v1086_v29, 4 }
  0x5f   : > { %2153 = vmatmul.mubr.msk.bf16.gmra.mrb[4].mxu1 %vm423_vm3, %v3099_v24  ;;  %2238 = vmatprep.mubr.msk.bf16.mxu0 %vm423_vm3, %v3066_v47 }
  0x60   : > { %2156 = vmatprep.mubr.msk.bf16.mxu1 %vm423_vm3, %v3103_v26 }
  0x66   : > { %2239 = vmatmul.mubr.msk.bf16.vlgmr.msra.gmra.mrb[0].mxu0 %vm423_vm3, %v3099_v24 }
  0x67   : > { %2157 = vmatmul.mubr.msk.bf16.gmra.mrb[8].mxu1 %vm423_vm3, %v3129_v62  ;;  %2255 = vmatpush3.bf16.msra.mxu0 %v1511_v20 }
  0x68   : > { %2160 = vmatprep.mubr.msk.bf16.mxu1 %vm423_vm3, %v3135_v4  ;;  %2242 = vmatprep.mubr.msk.bf16.mxu0 %vm423_vm3, %v3103_v26 }
  0x69   : > { %2429 = vmatprep.subr.msk.bf16.mxu0 %vm448_vm0, %v2032_v14 }
  0x6e   : > { %2243 = vmatmul.mubr.msk.bf16.gmra.mrb[4].mxu0 %vm423_vm3, %v3129_v62 }
  0x6f   : > { %2161 = vmatmul.mubr.msk.bf16.gmra.mrb[12].mxu1 %vm423_vm3, %v1946_v51  ;;  %2246 = vmatprep.mubr.msk.bf16.mxu0 %vm423_vm3, %v3135_v4 }
  0x70   : > { %2166 = vmatprep.mubr.msk.bf16.mxu1 %vm423_vm3, %v1964_v22 }
  0x76   : > { %2247 = vmatmul.mubr.msk.bf16.gmra.mrb[8].mxu0 %vm423_vm3, %v1946_v51 }
  0x77   : > { %2167 = vmatmul.mubr.msk.bf16.vlgmr.msra.gmra.mrb[0].mxu1 %vm423_vm3, %v2906_v46  ;;  %2250 = vmatprep.mubr.msk.bf16.mxu0 %vm423_vm3, %v1981_v57  ;;  %v1073_v46 = vshrl.u32 %v3024_v5, 16  ;;  %v1092_v5 = vshll.u32 %v3035_v19, 16 }
  0x78   : > { %2183 = vmatpush3.bf16.msra.mxu1 %v957_v36  ;;  %2170 = vmatprep.mubr.msk.bf16.mxu1 %vm423_vm3, %v2937_v11 }
  0x79   : > { %2425 = vmatprep.subr.msk.bf16.mxu1 %vm448_vm0, %v2702_v1  ;;  %v1082_v1 = vshll.u32 %v3013_v53, 16  ;;  %v1075_v34 = vrot.slane %v1073_v46, 4  ;;  %v1094_v49 = vrot.slane %v1092_v5, 5 }
  0x7b   : > { %v1084_v16 = vrot.slane %v1082_v1, 5 }
  0x7d   : > { %v1089_v53 = vor.u32 %v1088_v48, %v1084_v16 }
  0x7e   : > { %2251 = vmatmul.mubr.msk.bf16.gmra.mrb[12].mxu0 %vm423_vm3, %v2012_v42 }
  0x7f   : > { %2171 = vmatmul.mubr.msk.bf16.gmra.mrb[4].mxu1 %vm423_vm3, %v2975_v60  ;;  %2256 = vmatprep.mubr.msk.bf16.mxu0 %vm423_vm3, %v2850_v52  ;;  %v1079_v52 = vor.u32 %v1078_v23, %v1075_v34  ;;  %v1090_v37 = vrot.slane %v1089_v53, 4 }
  0x80   : > { %2174 = vmatprep.mubr.msk.bf16.mxu1 %vm423_vm3, %v3007_v44 }
  0x81   : > { %v1080_v32 = vrot.slane %v1079_v52, 4 }
  0x86   : > { %2257 = vmatmul.mubr.msk.bf16.vlgmr.msra.gmra.mrb[0].mxu0 %vm423_vm3, %v2878_v25  ;;  %v1085_v25 = vsel %vm2774_vm4, %v1080_v32, %v1084_v16 }
  0x87   : > { %2175 = vmatmul.mubr.msk.bf16.gmra.mrb[8].mxu1 %vm423_vm3, %v3017_v59  ;;  %2273 = vmatpush3.bf16.msra.mxu0 %v1643_v58 }
  0x88   : > { %2178 = vmatprep.mubr.msk.bf16.mxu1 %vm423_vm3, %v3046_v27  ;;  %2260 = vmatprep.mubr.msk.bf16.mxu0 %vm423_vm3, %v2904_v43  ;;  %v1095_v43 = vsel %vm2774_vm4, %v1090_v37, %v1094_v49 }
  0x89   : > { %v1991_v19 = vcombine.low %v1085_v25, %v1095_v43 }
  0x8e   : > { %2261 = vmatmul.mubr.msk.bf16.gmra.mrb[4].mxu0 %vm423_vm3, %v2953_v40 }
  0x8f   : > { %2179 = vmatmul.mubr.msk.bf16.gmra.mrb[12].mxu1 %vm423_vm3, %v3057_v35  ;;  %2264 = vmatprep.mubr.msk.bf16.mxu0 %vm423_vm3, %v2978_v10 }
  0x90   : > { %2184 = vmatprep.mubr.msk.bf16.mxu1 %vm423_vm3, %v3055_v9 }
  0x96   : > { %2265 = vmatmul.mubr.msk.bf16.gmra.mrb[8].mxu0 %vm423_vm3, %v3015_v55 }
  0x97   : > { %2185 = vmatmul.mubr.msk.bf16.vlgmr.msra.gmra.mrb[0].mxu1 %vm423_vm3, %v3066_v47  ;;  %2268 = vmatprep.mubr.msk.bf16.mxu0 %vm423_vm3, %v1991_v19 }
  0x98   : > { %2291 = vmatpush3.bf16.msra.mxu1 %v2711_v3  ;;  %2188 = vmatprep.mubr.msk.bf16.mxu1 %vm423_vm3, %v3099_v24 }
  0x9e   : > { %2269 = vmatmul.mubr.msk.bf16.gmra.mrb[12].mxu0 %vm423_vm3, %v2022_v28 }
  0x9f   : > { %2189 = vmatmul.mubr.msk.bf16.gmra.mrb[4].mxu1 %vm423_vm3, %v3103_v26  ;;  %2274 = vmatprep.mubr.msk.bf16.mxu0 %vm423_vm3, %v2937_v11 }
  0xa0   : > { %2192 = vmatprep.mubr.msk.bf16.mxu1 %vm423_vm3, %v3129_v62 }
  0xa6   : > { %2275 = vmatmul.mubr.msk.bf16.vlgmr.msra.gmra.mrb[0].mxu0 %vm423_vm3, %v2975_v60 }
  0xa7   : > { %2193 = vmatmul.mubr.msk.bf16.gmra.mrb[8].mxu1 %vm423_vm3, %v3135_v4  ;;  %2278 = vmatprep.mubr.msk.bf16.mxu0 %vm423_vm3, %v3007_v44 }
  0xa8   : > { %2196 = vmatprep.mubr.msk.bf16.mxu1 %vm423_vm3, %v1946_v51 }
  0xae   : > { %2279 = vmatmul.mubr.msk.bf16.gmra.mrb[4].mxu0 %vm423_vm3, %v3017_v59 }
  0xaf   : > { %2197 = vmatmul.mubr.msk.bf16.gmra.mrb[12].mxu1 %vm423_vm3, %v1981_v57  ;;  %2282 = vmatprep.mubr.msk.bf16.mxu0 %vm423_vm3, %v3046_v27 }
  0xb0   : > { %2210 = vmatprep.mubr.msk.bf16.mxu1 %vm423_vm3, %v2953_v40 }
  0xb6   : > { %2283 = vmatmul.mubr.msk.bf16.gmra.mrb[8].mxu0 %vm423_vm3, %v3057_v35 }
  0xb7   : > { %2211 = vmatmul.mubr.msk.bf16.vlgmr.msra.gmra.mrb[8].mxu1 %vm423_vm3, %v2978_v10  ;;  %2286 = vmatprep.mubr.msk.bf16.mxu0 %vm423_vm3, %v3092_v12 }
  0xb8   : > { %2214 = vmatprep.mubr.msk.bf16.mxu1 %vm423_vm3, %v3015_v55 }
  0xbe   : > { %2287 = vmatmul.mubr.msk.bf16.gmra.mrb[12].mxu0 %vm423_vm3, %v2033_v61 }
  0xbf   : > { %2215 = vmatmul.mubr.msk.bf16.gmra.mrb[12].mxu1 %vm423_vm3, %v1991_v19 }
 0x16a   : > { %v2186_v3 = vpop.f32.mrb[0].mxu1 }
 0x16b   : > { %v993_v33 = vpop.f32.mrb[1].mxu1 }
 0x16c   : > { %v2187_v11 = vpop.f32.mrb[2].mxu1 }
 0x16d   : > { %v996_v40 = vpop.f32.mrb[3].mxu1 }
 0x172   : > { %v2190_v60 = vpop.f32.mrb[4].mxu1 }
 0x173   : > { %v1009_v44 = vpop.f32.mrb[5].mxu1 }
 0x174   : > { %v2191_v10 = vpop.f32.mrb[6].mxu1 }
 0x175   : > { %v1012_v59 = vpop.f32.mrb[7].mxu1 }
 0x179   : > { %v2276_v27 = vpop.f32.mrb[0].mxu0 }
 0x17a   : > { %v2292_v9 = vadd.f32 %v2276_v27, %v2186_v3  ;;  %v1679_v35 = vpop.f32.mrb[1].mxu0 }
 0x17b   : > { %v2293_v47 = vadd.f32 %v1679_v35, %v993_v33  ;;  %v2277_v55 = vpop.f32.mrb[2].mxu0 }
 0x17c   : > { %v2294_v6 = vadd.f32 %v2277_v55, %v2187_v11  ;;  %v1682_v17 = vpop.f32.mrb[3].mxu0  ;;  %v1782_v12 = vmul.f32 %v2292_v9, %v2292_v9 }
 0x17d   : > { %v2295_v22 = vadd.f32 %v1682_v17, %v996_v40  ;;  %v1780_v50 = vmul.f32 %v2293_v47, %v2293_v47 }
 0x17e   : > { %v1783_v38 = vmul.f32 %v2294_v6, %v2294_v6 }
 0x17f   : > { %v1758_v63 = vadd.f32 %v2295_v22, %v2293_v47  ;;  %v1781_v54 = vmul.f32 %v2295_v22, %v2295_v22 }
 0x181   : > { %v1759_v45 = vadd.f32 %v2292_v9, %v1758_v63  ;;  %v1796_v15 = vadd.f32 %v1781_v54, %v1780_v50  ;;  %v2280_v39 = vpop.f32.mrb[4].mxu0 }
 0x182   : > { %v2296_v2 = vadd.f32 %v2280_v39, %v2190_v60  ;;  %v1695_v21 = vpop.f32.mrb[5].mxu0 }
 0x183   : > { %v1797_v24 = vadd.f32 %v1796_v15, %v1782_v12  ;;  %v2297_v26 = vadd.f32 %v1695_v21, %v1009_v44  ;;  %v1760_v18 = vadd.f32 %v2294_v6, %v1759_v45  ;;  %v2281_v30 = vpop.f32.mrb[6].mxu0 }
 0x184   : > { %v2298_v31 = vadd.f32 %v2281_v30, %v2191_v10  ;;  %v1698_v7 = vpop.f32.mrb[7].mxu0  ;;  %v1786_v20 = vmul.f32 %v2296_v2, %v2296_v2 }
 0x185   : > { %v1761_v41 = vadd.f32 %v2297_v26, %v1760_v18  ;;  %v1784_v8 = vmul.f32 %v2297_v26, %v2297_v26  ;;  %v1798_v56 = vadd.f32 %v1797_v24, %v1783_v38  ;;  %v2299_v61 = vadd.f32 %v1698_v7, %v1012_v59 }
 0x186   : > { %v1787_v42 = vmul.f32 %v2298_v31, %v2298_v31 }
 0x187   : > { %v1799_v13 = vadd.f32 %v1798_v56, %v1784_v8  ;;  %v1762_v28 = vadd.f32 %v2299_v61, %v1761_v41  ;;  %v1785_v62 = vmul.f32 %v2299_v61, %v2299_v61 }
 0x189   : > { %v1763_v4 = vadd.f32 %v2296_v2, %v1762_v28  ;;  %v1800_v14 = vadd.f32 %v1799_v13, %v1785_v62  ;;  %v2284_v51 = vpop.f32.mrb[8].mxu0 }
 0x18a   : > { %v2212_v57 = vpop.f32.mrb[8].mxu1  ;;  %v1711_v36 = vpop.f32.mrb[9].mxu0 }
 0x18b   : > { %v1801_v46 = vadd.f32 %v1800_v14, %v1786_v20  ;;  %v2300_v0 = vadd.f32 %v2284_v51, %v2212_v57  ;;  %v1173_v1 = vpop.f32.mrb[9].mxu1  ;;  %v1764_v29 = vadd.f32 %v2298_v31, %v1763_v4  ;;  %v2285_v58 = vpop.f32.mrb[10].mxu0 }
 0x18c   : > { %v2301_v34 = vadd.f32 %v1711_v36, %v1173_v1  ;;  %v2213_v23 = vpop.f32.mrb[10].mxu1  ;;  %v1714_v16 = vpop.f32.mrb[11].mxu0 }
 0x18d   : > { %v1802_v48 = vadd.f32 %v1801_v46, %v1787_v42  ;;  %v2302_v52 = vadd.f32 %v2285_v58, %v2213_v23  ;;  %v1176_v53 = vpop.f32.mrb[11].mxu1  ;;  %v1790_v3 = vmul.f32 %v2300_v0, %v2300_v0 }
 0x18e   : > { %v1765_v5 = vadd.f32 %v2301_v34, %v1764_v29  ;;  %v1788_v32 = vmul.f32 %v2301_v34, %v2301_v34  ;;  %v2303_v37 = vadd.f32 %v1714_v16, %v1176_v53 }
 0x18f   : > { %v1791_v27 = vmul.f32 %v2302_v52, %v2302_v52 }
 0x190   : > { %v1803_v49 = vadd.f32 %v1802_v48, %v1788_v32  ;;  %v1766_v25 = vadd.f32 %v2303_v37, %v1765_v5  ;;  %v1789_v43 = vmul.f32 %v2303_v37, %v2303_v37 }
 0x191   : > { %v2288_v19 = vpop.f32.mrb[12].mxu0 }
 0x192   : > { %v1767_v33 = vadd.f32 %v2300_v0, %v1766_v25  ;;  %v1804_v11 = vadd.f32 %v1803_v49, %v1789_v43  ;;  %v2216_v40 = vpop.f32.mrb[12].mxu1  ;;  %v1727_v60 = vpop.f32.mrb[13].mxu0 }
 0x193   : > { %v2304_v44 = vadd.f32 %v2288_v19, %v2216_v40  ;;  %v1189_v10 = vpop.f32.mrb[13].mxu1  ;;  %v2289_v59 = vpop.f32.mrb[14].mxu0 }
 0x194   : > { %v1805_v9 = vadd.f32 %v1804_v11, %v1790_v3  ;;  %v2305_v35 = vadd.f32 %v1727_v60, %v1189_v10  ;;  %v1768_v47 = vadd.f32 %v2302_v52, %v1767_v33  ;;  %v2217_v55 = vpop.f32.mrb[14].mxu1  ;;  %v1730_v6 = vpop.f32.mrb[15].mxu0 }
 0x195   : > { %v2306_v17 = vadd.f32 %v2289_v59, %v2217_v55  ;;  %v1192_v22 = vpop.f32.mrb[15].mxu1  ;;  %v1794_v2 = vmul.f32 %v2304_v44, %v2304_v44 }
 0x196   : > { %v1769_v50 = vadd.f32 %v2305_v35, %v1768_v47  ;;  %v1792_v63 = vmul.f32 %v2305_v35, %v2305_v35  ;;  %v1806_v54 = vadd.f32 %v1805_v9, %v1791_v27  ;;  %v2307_v12 = vadd.f32 %v1730_v6, %v1192_v22 }
 0x197   : > { %v1795_v24 = vmul.f32 %v2306_v17, %v2306_v17 }
 0x198   : > { %v1807_v45 = vadd.f32 %v1806_v54, %v1792_v63  ;;  %v1770_v15 = vadd.f32 %v2307_v12, %v1769_v50  ;;  %v1793_v39 = vmul.f32 %v2307_v12, %v2307_v12 }
 0x19a   : > { %v1771_v21 = vadd.f32 %v2304_v44, %v1770_v15  ;;  %v1808_v38 = vadd.f32 %v1807_v45, %v1793_v39 }
 0x19c   : > { %v1772_v26 = vadd.f32 %v2306_v17, %v1771_v21  ;;  %v1809_v18 = vadd.f32 %v1808_v38, %v1794_v2 }
 0x19e   : > { %v1773_v30 = vrot.slane %v1772_v26, 4  ;;  %v1810_v31 = vadd.f32 %v1809_v18, %v1795_v24 }
 0x1a0   : > { %v1774_v7 = vadd.f32 %v1773_v30, %v1772_v26  ;;  %v1811_v41 = vrot.slane %v1810_v31, 4 }
 0x1a2   : > { %v1775_v8 = vrot.slane %v1774_v7, 2  ;;  %v1812_v56 = vadd.f32 %v1811_v41, %v1810_v31 }
 0x1a4   : > { %v1776_v61 = vadd.f32 %v1775_v8, %v1774_v7  ;;  %v1813_v13 = vrot.slane %v1812_v56, 2 }
 0x1a6   : > { %v1777_v28 = vrot.slane %v1776_v61, 1  ;;  %v1814_v62 = vadd.f32 %v1813_v13, %v1812_v56 }
 0x1a8   : > { %v1778_v20 = vadd.f32 %v1777_v28, %v1776_v61  ;;  %v1815_v4 = vrot.slane %v1814_v62, 1 }
 0x1aa   : > { %1779 = vst [vmem:[%s160_s30] sm:$0x1] %v1778_v20  ;;  %v1816_v14 = vadd.f32 %v1815_v4, %v1814_v62 }
 0x1ac   : > { %1817 = vst [vmem:[%s160_s30 + $0x1] sm:$0x1] %v1816_v14 }
 0x1ad   : > { %2526 = shalt.err (!%p2523_p7)
}
 0x1ae   : > { %s2527_s18 = scalar_lea.hbm %s3251_s6, 32  ;;  %s2531_s25 = scalar_lea.hbm %s3306_s2, 128 }
 0x1af   : > { %p2528_p9 = scmp.ne.s32.totalorder %s3251_s6, %s2527_s18  ;;  %p2532_p12 = scmp.lt.u32.totalorder %s3251_s6, %s3306_s2 }
 0x1b0   : > { %p2533_p13 = scmp.lt.u32.totalorder %s2531_s25, %s2527_s18  ;;  %p2535_p1 = scmp.lt.u32.totalorder %s2527_s18, %s3251_s6 }
 0x1b1   : > { %p2529_p10 = pnand %p2528_p9, %p2676_p3 }
 0x1b2   : > { %p2534_p0 = por %p2533_p13, %p2532_p12 }
 0x1b3   : > { %p2530_p11 = pneg %p2529_p10 }
 0x1b4   : > { %p2536_p2 = por %p2535_p1, %p2534_p0 }
 0x1b6   : > { %p2537_p4 = pnand %p2536_p2, %p2530_p11 }
 0x1b8   : > { %2540 = shalt.err (!%p2537_p4)
}
 0x1b9   : > { %2432 = dma.vmem_to_hbm [thread:$0]  (%p2676_p3), %s3253_s3, 32, %s3251_s6, %s1819_s12  }
 0x1ba PF: > { %p2438_p5 = scmp.ge.s32.totalorder %s2607_s16, 2  ;;  %s1846_s29 = sand.u32 1, %s2579_s9  }
 0x1bb   : > { %s1847_s30 = scalar_lea.sflag [#allocation3], %s1846_s29 }
 0x1bc   : > { %p2435_p6 = pnand %p2438_p5, %p2685_p8 }
 0x1be   : > { %2574 = dma.done.wait (!%p2435_p6), %s1847_s30, 32  }
 0x1bf   : > { %2576 = vsyncadd (!%p2435_p6), %s1847_s30, 4294967264  ;;  %s15_s16 = sadd.s32 1, %s2607_s16   ;;  %s3313_s9 = smov %s2583_s10 }
 0x1c0   : > { %p12_p7 = scmp.ge.s32.totalorder %s15_s16, 6   ;;  %s3314_s10 = smov %s2587_s11 }
 0x1c1   : > { %s3315_s11 = smov %s2694_s27  ;;  %s3316_s12 = smov %s2599_s14 }
 0x1c2   : > { %s3317_s13 = smov %s2603_s15  ;;  %s3318_s14 = smov %s3321_s19 }
 0x1c3   : > { %s3319_s15 = smov %s3325_s20  ;;  %14 = sbr.rel (!%p12_p7) target bundleno = 5 (0x5), region = 71 }
 0x1ca   :  { %1852 = vsyncpa [#allocation3], 1 }
 0x1cb   :  { %1854 = vsyncpa [#allocation3 + $0x1], 1 }

</bundles_post_ra>
